<compile_context>
chip_gen: v7x
topology: tpu7x:2x2x1
jax: 0.10.0
libtpu: 0.0.40
codegen_flags: <defaults>
</compile_context>

<pallas_src>
import jax
import jax.numpy as jnp
from jax import lax
from jax.experimental import pallas as pl
from jax.experimental.pallas import tpu as pltpu


def _bilstm_kernel(g_ref, m_ref, whh_ref, wfc_ref, bfc_ref, out_ref, h_scr, c_scr):
    """One grid step = one chunk of Tc timesteps of the fused bidirectional recurrence."""
    chunk = pl.program_id(0)
    n_chunks = pl.num_programs(0)
    Tc = g_ref.shape[0]
    H2 = h_scr.shape[-1]            # 2*H  (fwd | bwd halves of the state)

    @pl.when(chunk == 0)
    def _():
        h_scr[...] = jnp.zeros_like(h_scr)
        c_scr[...] = jnp.zeros_like(c_scr)

    whh = whh_ref[...]              # (2H, 8H) block-diagonal recurrent weight, read once per chunk

    def step(lt, carry):
        h2, c2 = carry
        # fused gates for both directions: precomputed x-projection + one recurrent MXU call
        g = g_ref[lt] + jnp.dot(h2, whh, preferred_element_type=jnp.float32)   # (B, 8H)
        i_g = jax.nn.sigmoid(g[:, 0 * H2:1 * H2])
        f_g = jax.nn.sigmoid(g[:, 1 * H2:2 * H2])
        g_g = jnp.tanh(g[:, 2 * H2:3 * H2])
        o_g = jax.nn.sigmoid(g[:, 3 * H2:4 * H2])
        c_new = f_g * c2 + i_g * g_g
        h_new = o_g * jnp.tanh(c_new)
        m = m_ref[lt]               # (B, 2H) 0/1 mask: pack_padded_sequence semantics
        h2 = m * h_new + (1.0 - m) * h2
        c2 = m * c_new + (1.0 - m) * c2
        return h2, c2

    h2, c2 = lax.fori_loop(0, Tc, step, (h_scr[...], c_scr[...]), unroll=True)
    h_scr[...] = h2
    c_scr[...] = c2

    # final chunk: fc(cat(h_fwd, h_bwd)) + sigmoid (h2 is already [h_f | h_b])
    @pl.when(chunk == n_chunks - 1)
    def _():
        logits = (jnp.dot(h2, wfc_ref[...], preferred_element_type=jnp.float32)
                  + bfc_ref[...])
        out_ref[...] = jax.nn.sigmoid(logits)


def lstm_forward(text, text_lengths, params, time_chunk=16):
    """text: (B, T) int32 token ids; text_lengths: (B,) int32 valid lengths."""
    emb = params["embedding"][text].astype(jnp.float32)       # (B, T, E)  gather (glue)
    B, T, E = emb.shape
    H = params["w_hh_f"].shape[0]
    O = params["w_fc"].shape[1]

    x = jnp.transpose(emb, (1, 0, 2))                         # (T, B, E) time-major
    Tc = min(int(time_chunk), T)
    Tp = ((T + Tc - 1) // Tc) * Tc                            # padded time
    pad = Tp - T

    # ---- hoisted input projections (one big matmul per direction) ----
    xf = x.reshape(T * B, E)
    Gf = (xf @ params["w_ih_f"] + params["b_f"]).reshape(T, B, 4 * H)
    Gb = (xf @ params["w_ih_b"] + params["b_b"]).reshape(T, B, 4 * H)
    Gf = jnp.pad(Gf, ((0, pad), (0, 0), (0, 0)))
    Gb = jnp.pad(Gb, ((0, pad), (0, 0), (0, 0)))[::-1]        # backward stream: reversed time

    # interleave into fused gate-major layout: [i_f i_b | f_f f_b | g_f g_b | o_f o_b]
    G = jnp.stack([Gf.reshape(Tp, B, 4, H), Gb.reshape(Tp, B, 4, H)], axis=3)
    G = G.reshape(Tp, B, 8 * H).astype(jnp.float32)

    # fused block-diagonal recurrent weight (2H, 8H) in the same gate-major layout
    zeros = jnp.zeros((H, 4, H), jnp.float32)
    top = jnp.stack([params["w_hh_f"].reshape(H, 4, H), zeros], axis=2).reshape(H, 8 * H)
    bot = jnp.stack([zeros, params["w_hh_b"].reshape(H, 4, H)], axis=2).reshape(H, 8 * H)
    w_bd = jnp.concatenate([top, bot], axis=0)                # (2H, 8H)

    # fused per-step update masks (forward half | backward half) -> (Tp, B, 2H)
    lens = text_lengths.astype(jnp.int32)
    t_idx = jnp.arange(Tp, dtype=jnp.int32)
    mf = (t_idx[:, None] < lens[None, :]).astype(jnp.float32)            # (Tp, B)
    mb = ((Tp - 1 - t_idx)[:, None] < lens[None, :]).astype(jnp.float32)  # (Tp, B)
    mask = jnp.concatenate(
        [jnp.broadcast_to(mf[:, :, None], (Tp, B, H)),
         jnp.broadcast_to(mb[:, :, None], (Tp, B, H))], axis=-1)

    n_chunks = Tp // Tc
    const2 = lambda c: (0, 0)

    out = pl.pallas_call(
        _bilstm_kernel,
        out_shape=jax.ShapeDtypeStruct((B, O), jnp.float32),
        grid=(n_chunks,),
        in_specs=[
            pl.BlockSpec((Tc, B, 8 * H), lambda c: (c, 0, 0)),   # precomputed fused gates
            pl.BlockSpec((Tc, B, 2 * H), lambda c: (c, 0, 0)),   # fused update masks
            pl.BlockSpec((2 * H, 8 * H), const2),                # block-diag W_hh (fwd+bwd)
            pl.BlockSpec((2 * H, O), const2),                    # fc weight
            pl.BlockSpec((1, O), const2),                        # fc bias
        ],
        out_specs=pl.BlockSpec((B, O), const2),
        scratch_shapes=[pltpu.VMEM((B, 2 * H), jnp.float32),     # h = [h_f | h_b]
                        pltpu.VMEM((B, 2 * H), jnp.float32)],    # c = [c_f | c_b]
        compiler_params=pltpu.CompilerParams(
            dimension_semantics=("arbitrary",)),                 # sequential recurrence
    )(G, mask, w_bd, params["w_fc"], params["b_fc"])
    return out


def _reference_forward(text, text_lengths, params):
    """Pure-JAX reference (same semantics as nn.LSTM + pack_padded_sequence head)."""
    emb = params["embedding"][text]                 # (B, T, E)
    B, T, E = emb.shape
    H = params["w_hh_f"].shape[0]

    def cell(x, h, c, wi, wh, b):
        g = x @ wi + h @ wh + b
        i = jax.nn.sigmoid(g[:, 0 * H:1 * H])
        f = jax.nn.sigmoid(g[:, 1 * H:2 * H])
        gg = jnp.tanh(g[:, 2 * H:3 * H])
        o = jax.nn.sigmoid(g[:, 3 * H:4 * H])
        c_new = f * c + i * gg
        return o * jnp.tanh(c_new), c_new

    lens = text_lengths.reshape(B, 1)
    hf = cf = hb = cb = jnp.zeros((B, H), jnp.float32)
    for t in range(T):
        hn, cn = cell(emb[:, t, :], hf, cf, params["w_ih_f"], params["w_hh_f"], params["b_f"])
        m = t < lens
        hf = jnp.where(m, hn, hf); cf = jnp.where(m, cn, cf)

        tb = T - 1 - t
        hn, cn = cell(emb[:, tb, :], hb, cb, params["w_ih_b"], params["w_hh_b"], params["b_b"])
        m = tb < lens
        hb = jnp.where(m, hn, hb); cb = jnp.where(m, cn, cb)

    hidden = jnp.concatenate([hf, hb], axis=1)
    return jax.nn.sigmoid(hidden @ params["w_fc"] + params["b_fc"])


def init_params(key, vocab_size, emb_dim, hidden_dim, output_dim):
    ks = jax.random.split(key, 10)
    s = 1.0 / jnp.sqrt(hidden_dim)
    u = lambda k, shape: jax.random.uniform(k, shape, jnp.float32, -s, s)
    return {
        "embedding": jax.random.normal(ks[0], (vocab_size, emb_dim), jnp.float32),
        # weights stored pre-transposed: x @ W_ih (E,4H), h @ W_hh (H,4H); gate order i,f,g,o
        "w_ih_f": u(ks[1], (emb_dim, 4 * hidden_dim)),
        "w_hh_f": u(ks[2], (hidden_dim, 4 * hidden_dim)),
        "b_f": u(ks[3], (1, 4 * hidden_dim)),          # b_ih + b_hh folded
        "w_ih_b": u(ks[4], (emb_dim, 4 * hidden_dim)),
        "w_hh_b": u(ks[5], (hidden_dim, 4 * hidden_dim)),
        "b_b": u(ks[6], (1, 4 * hidden_dim)),
        "w_fc": u(ks[7], (2 * hidden_dim, output_dim)),
        "b_fc": u(ks[8], (1, output_dim)),
    }


if __name__ == "__main__":
    VOCAB, EMB, HID, OUT = 50, 32, 32, 1

    key = jax.random.PRNGKey(0)
    kp, kt1, kt2 = jax.random.split(key, 3)
    params = init_params(kp, VOCAB, EMB, HID, OUT)

    # --- test 1: same small shapes as before, multi-chunk path (Tc=4 -> 2 chunks) ---
    B1, T1 = 2, 8
    text1 = jax.random.randint(kt1, (B1, T1), 0, VOCAB, dtype=jnp.int32)
    lens1 = jnp.array([8, 5], dtype=jnp.int32)
    out1 = jax.block_until_ready(lstm_forward(text1, lens1, params, time_chunk=4))
    ref1 = _reference_forward(text1, lens1, params)
    assert out1.shape == (B1, OUT)
    assert jnp.allclose(out1, ref1, atol=1e-5, rtol=1e-5), (out1, ref1)

    # --- test 2: non-multiple T (padding path) + more varied lengths ---
    B2, T2 = 3, 37
    text2 = jax.random.randint(kt2, (B2, T2), 0, VOCAB, dtype=jnp.int32)
    lens2 = jnp.array([37, 20, 1], dtype=jnp.int32)
    out2 = jax.block_until_ready(lstm_forward(text2, lens2, params, time_chunk=16))
    ref2 = _reference_forward(text2, lens2, params)
    assert out2.shape == (B2, OUT)
    assert jnp.allclose(out2, ref2, atol=5e-5, rtol=5e-5), (out2, ref2)

    print("KERNEL_OK")
</pallas_src>

<mosaic_0001>
module attributes {stable_mosaic.version = 11 : i64} {
  func.func @_bilstm_kernel(%arg0: i32, %arg1: memref<4x2x256xf32, #tpu.memory_space<vmem>>, %arg2: memref<4x2x64xf32, #tpu.memory_space<vmem>>, %arg3: memref<64x256xf32, #tpu.memory_space<vmem>>, %arg4: memref<64x1xf32, #tpu.memory_space<vmem>>, %arg5: memref<1x1xf32, #tpu.memory_space<vmem>>, %arg6: memref<2x1xf32, #tpu.memory_space<vmem>>, %arg7: memref<2x64xf32, #tpu.memory_space<vmem>>, %arg8: memref<2x64xf32, #tpu.memory_space<vmem>>) attributes {dimension_semantics = [#tpu.dimension_semantics<arbitrary>], iteration_bounds = array<i64: 2>, scalar_prefetch = 0 : i64, scratch_operands = 2 : i64, tpu.core_type = #tpu.core_type<tc>, window_params = [{transform_indices = @transform_0, window_bounds = array<i64: 4, 2, 256>}, {transform_indices = @transform_1, window_bounds = array<i64: 4, 2, 64>}, {pipeline_mode = #tpu.pipeline_mode<synchronous>, transform_indices = @transform_2, window_bounds = array<i64: 64, 256>}, {pipeline_mode = #tpu.pipeline_mode<synchronous>, transform_indices = @transform_3, window_bounds = array<i64: 64, 1>}, {pipeline_mode = #tpu.pipeline_mode<synchronous>, transform_indices = @transform_4, window_bounds = array<i64: 1, 1>}, {pipeline_mode = #tpu.pipeline_mode<synchronous>, transform_indices = @transform_5, window_bounds = array<i64: 2, 1>}]} {
    %c0_i32 = arith.constant 0 : i32
    %0 = arith.cmpi eq, %arg0, %c0_i32 : i32
    %1 = arith.extui %0 : i1 to i32
    %c0_i32_0 = arith.constant 0 : i32
    %2 = arith.cmpi ne, %1, %c0_i32_0 : i32
    scf.if %2 {
      %cst_52 = arith.constant 0.000000e+00 : f32
      %183 = vector.broadcast %cst_52 : f32 to vector<2x64xf32>
      %c0_53 = arith.constant 0 : index
      %c0_54 = arith.constant 0 : index
      %184 = vector.load %arg7[%c0_53, %c0_54] : memref<2x64xf32, #tpu.memory_space<vmem>>, vector<2x64xf32>
      tpu.vector_store %arg7[%c0_53, %c0_54], %183 {strides = array<i32>} : memref<2x64xf32, #tpu.memory_space<vmem>>, vector<2x64xf32>,
      %cst_55 = arith.constant 0.000000e+00 : f32
      %185 = vector.broadcast %cst_55 : f32 to vector<2x64xf32>
      %c0_56 = arith.constant 0 : index
      %c0_57 = arith.constant 0 : index
      %186 = vector.load %arg8[%c0_56, %c0_57] : memref<2x64xf32, #tpu.memory_space<vmem>>, vector<2x64xf32>
      tpu.vector_store %arg8[%c0_56, %c0_57], %185 {strides = array<i32>} : memref<2x64xf32, #tpu.memory_space<vmem>>, vector<2x64xf32>,
    } else {
    }
    %c0 = arith.constant 0 : index
    %c0_1 = arith.constant 0 : index
    %3 = vector.load %arg3[%c0, %c0_1] : memref<64x256xf32, #tpu.memory_space<vmem>>, vector<64x256xf32>
    %c0_2 = arith.constant 0 : index
    %c0_3 = arith.constant 0 : index
    %4 = vector.load %arg7[%c0_2, %c0_3] : memref<2x64xf32, #tpu.memory_space<vmem>>, vector<2x64xf32>
    %c0_4 = arith.constant 0 : index
    %c0_5 = arith.constant 0 : index
    %5 = vector.load %arg8[%c0_4, %c0_5] : memref<2x64xf32, #tpu.memory_space<vmem>>, vector<2x64xf32>
    %c0_i32_6 = arith.constant 0 : i32
    %6 = arith.index_cast %c0_i32_6 : i32 to index
    %c0_7 = arith.constant 0 : index
    %c0_8 = arith.constant 0 : index
    %7 = vector.load %arg1[%6, %c0_7, %c0_8] : memref<4x2x256xf32, #tpu.memory_space<vmem>>, vector<1x2x256xf32>
    %8 = vector.shape_cast %7 : vector<1x2x256xf32> to vector<2x256xf32>
    %cst = arith.constant dense<0.000000e+00> : vector<2x256xf32>
    %9 = tpu.matmul %4, %3, %cst {dimension_numbers = #tpu.dot_dimension_numbers<[1], [0], [0], [1], [0, 0, 1, 1], [], []>} : vector<2x64xf32>, vector<64x256xf32>, vector<2x256xf32> -> vector<2x256xf32>
    %10 = arith.addf %8, %9 : vector<2x256xf32>
    %11 = vector.extract_strided_slice %10 {offsets = [0, 0], sizes = [2, 64], strides = [1, 1]} : vector<2x256xf32> to vector<2x64xf32>
    %12 = arith.negf %11 : vector<2x64xf32>
    %13 = math.exp %12 : vector<2x64xf32>
    %cst_9 = arith.constant 1.000000e+00 : f32
    %14 = vector.broadcast %cst_9 : f32 to vector<2x64xf32>
    %15 = arith.addf %14, %13 : vector<2x64xf32>
    %16 = arith.divf %14, %15 : vector<2x64xf32>
    %17 = vector.extract_strided_slice %10 {offsets = [0, 64], sizes = [2, 64], strides = [1, 1]} : vector<2x256xf32> to vector<2x64xf32>
    %18 = arith.negf %17 : vector<2x64xf32>
    %19 = math.exp %18 : vector<2x64xf32>
    %cst_10 = arith.constant 1.000000e+00 : f32
    %20 = vector.broadcast %cst_10 : f32 to vector<2x64xf32>
    %21 = arith.addf %20, %19 : vector<2x64xf32>
    %22 = arith.divf %20, %21 : vector<2x64xf32>
    %23 = vector.extract_strided_slice %10 {offsets = [0, 128], sizes = [2, 64], strides = [1, 1]} : vector<2x256xf32> to vector<2x64xf32>
    %24 = math.tanh %23 : vector<2x64xf32>
    %25 = vector.extract_strided_slice %10 {offsets = [0, 192], sizes = [2, 64], strides = [1, 1]} : vector<2x256xf32> to vector<2x64xf32>
    %26 = arith.negf %25 : vector<2x64xf32>
    %27 = math.exp %26 : vector<2x64xf32>
    %cst_11 = arith.constant 1.000000e+00 : f32
    %28 = vector.broadcast %cst_11 : f32 to vector<2x64xf32>
    %29 = arith.addf %28, %27 : vector<2x64xf32>
    %30 = arith.divf %28, %29 : vector<2x64xf32>
    %31 = arith.mulf %22, %5 : vector<2x64xf32>
    %32 = arith.mulf %16, %24 : vector<2x64xf32>
    %33 = arith.addf %31, %32 : vector<2x64xf32>
    %34 = math.tanh %33 : vector<2x64xf32>
    %35 = arith.mulf %30, %34 : vector<2x64xf32>
    %36 = arith.index_cast %c0_i32_6 : i32 to index
    %c0_12 = arith.constant 0 : index
    %c0_13 = arith.constant 0 : index
    %37 = vector.load %arg2[%36, %c0_12, %c0_13] : memref<4x2x64xf32, #tpu.memory_space<vmem>>, vector<1x2x64xf32>
    %38 = vector.shape_cast %37 : vector<1x2x64xf32> to vector<2x64xf32>
    %39 = arith.mulf %38, %35 : vector<2x64xf32>
    %cst_14 = arith.constant 1.000000e+00 : f32
    %40 = vector.broadcast %cst_14 : f32 to vector<2x64xf32>
    %41 = arith.subf %40, %38 : vector<2x64xf32>
    %42 = arith.mulf %41, %4 : vector<2x64xf32>
    %43 = arith.addf %39, %42 : vector<2x64xf32>
    %44 = arith.mulf %38, %33 : vector<2x64xf32>
    %cst_15 = arith.constant 1.000000e+00 : f32
    %45 = vector.broadcast %cst_15 : f32 to vector<2x64xf32>
    %46 = arith.subf %45, %38 : vector<2x64xf32>
    %47 = arith.mulf %46, %5 : vector<2x64xf32>
    %48 = arith.addf %44, %47 : vector<2x64xf32>
    %c1_i32 = arith.constant 1 : i32
    %49 = arith.index_cast %c1_i32 : i32 to index
    %c0_16 = arith.constant 0 : index
    %c0_17 = arith.constant 0 : index
    %50 = vector.load %arg1[%49, %c0_16, %c0_17] : memref<4x2x256xf32, #tpu.memory_space<vmem>>, vector<1x2x256xf32>
    %51 = vector.shape_cast %50 : vector<1x2x256xf32> to vector<2x256xf32>
    %cst_18 = arith.constant dense<0.000000e+00> : vector<2x256xf32>
    %52 = tpu.matmul %43, %3, %cst_18 {dimension_numbers = #tpu.dot_dimension_numbers<[1], [0], [0], [1], [0, 0, 1, 1], [], []>} : vector<2x64xf32>, vector<64x256xf32>, vector<2x256xf32> -> vector<2x256xf32>
    %53 = arith.addf %51, %52 : vector<2x256xf32>
    %54 = vector.extract_strided_slice %53 {offsets = [0, 0], sizes = [2, 64], strides = [1, 1]} : vector<2x256xf32> to vector<2x64xf32>
    %55 = arith.negf %54 : vector<2x64xf32>
    %56 = math.exp %55 : vector<2x64xf32>
    %cst_19 = arith.constant 1.000000e+00 : f32
    %57 = vector.broadcast %cst_19 : f32 to vector<2x64xf32>
    %58 = arith.addf %57, %56 : vector<2x64xf32>
    %59 = arith.divf %57, %58 : vector<2x64xf32>
    %60 = vector.extract_strided_slice %53 {offsets = [0, 64], sizes = [2, 64], strides = [1, 1]} : vector<2x256xf32> to vector<2x64xf32>
    %61 = arith.negf %60 : vector<2x64xf32>
    %62 = math.exp %61 : vector<2x64xf32>
    %cst_20 = arith.constant 1.000000e+00 : f32
    %63 = vector.broadcast %cst_20 : f32 to vector<2x64xf32>
    %64 = arith.addf %63, %62 : vector<2x64xf32>
    %65 = arith.divf %63, %64 : vector<2x64xf32>
    %66 = vector.extract_strided_slice %53 {offsets = [0, 128], sizes = [2, 64], strides = [1, 1]} : vector<2x256xf32> to vector<2x64xf32>
    %67 = math.tanh %66 : vector<2x64xf32>
    %68 = vector.extract_strided_slice %53 {offsets = [0, 192], sizes = [2, 64], strides = [1, 1]} : vector<2x256xf32> to vector<2x64xf32>
    %69 = arith.negf %68 : vector<2x64xf32>
    %70 = math.exp %69 : vector<2x64xf32>
    %cst_21 = arith.constant 1.000000e+00 : f32
    %71 = vector.broadcast %cst_21 : f32 to vector<2x64xf32>
    %72 = arith.addf %71, %70 : vector<2x64xf32>
    %73 = arith.divf %71, %72 : vector<2x64xf32>
    %74 = arith.mulf %65, %48 : vector<2x64xf32>
    %75 = arith.mulf %59, %67 : vector<2x64xf32>
    %76 = arith.addf %74, %75 : vector<2x64xf32>
    %77 = math.tanh %76 : vector<2x64xf32>
    %78 = arith.mulf %73, %77 : vector<2x64xf32>
    %79 = arith.index_cast %c1_i32 : i32 to index
    %c0_22 = arith.constant 0 : index
    %c0_23 = arith.constant 0 : index
    %80 = vector.load %arg2[%79, %c0_22, %c0_23] : memref<4x2x64xf32, #tpu.memory_space<vmem>>, vector<1x2x64xf32>
    %81 = vector.shape_cast %80 : vector<1x2x64xf32> to vector<2x64xf32>
    %82 = arith.mulf %81, %78 : vector<2x64xf32>
    %cst_24 = arith.constant 1.000000e+00 : f32
    %83 = vector.broadcast %cst_24 : f32 to vector<2x64xf32>
    %84 = arith.subf %83, %81 : vector<2x64xf32>
    %85 = arith.mulf %84, %43 : vector<2x64xf32>
    %86 = arith.addf %82, %85 : vector<2x64xf32>
    %87 = arith.mulf %81, %76 : vector<2x64xf32>
    %cst_25 = arith.constant 1.000000e+00 : f32
    %88 = vector.broadcast %cst_25 : f32 to vector<2x64xf32>
    %89 = arith.subf %88, %81 : vector<2x64xf32>
    %90 = arith.mulf %89, %48 : vector<2x64xf32>
    %91 = arith.addf %87, %90 : vector<2x64xf32>
    %c2_i32 = arith.constant 2 : i32
    %92 = arith.index_cast %c2_i32 : i32 to index
    %c0_26 = arith.constant 0 : index
    %c0_27 = arith.constant 0 : index
    %93 = vector.load %arg1[%92, %c0_26, %c0_27] : memref<4x2x256xf32, #tpu.memory_space<vmem>>, vector<1x2x256xf32>
    %94 = vector.shape_cast %93 : vector<1x2x256xf32> to vector<2x256xf32>
    %cst_28 = arith.constant dense<0.000000e+00> : vector<2x256xf32>
    %95 = tpu.matmul %86, %3, %cst_28 {dimension_numbers = #tpu.dot_dimension_numbers<[1], [0], [0], [1], [0, 0, 1, 1], [], []>} : vector<2x64xf32>, vector<64x256xf32>, vector<2x256xf32> -> vector<2x256xf32>
    %96 = arith.addf %94, %95 : vector<2x256xf32>
    %97 = vector.extract_strided_slice %96 {offsets = [0, 0], sizes = [2, 64], strides = [1, 1]} : vector<2x256xf32> to vector<2x64xf32>
    %98 = arith.negf %97 : vector<2x64xf32>
    %99 = math.exp %98 : vector<2x64xf32>
    %cst_29 = arith.constant 1.000000e+00 : f32
    %100 = vector.broadcast %cst_29 : f32 to vector<2x64xf32>
    %101 = arith.addf %100, %99 : vector<2x64xf32>
    %102 = arith.divf %100, %101 : vector<2x64xf32>
    %103 = vector.extract_strided_slice %96 {offsets = [0, 64], sizes = [2, 64], strides = [1, 1]} : vector<2x256xf32> to vector<2x64xf32>
    %104 = arith.negf %103 : vector<2x64xf32>
    %105 = math.exp %104 : vector<2x64xf32>
    %cst_30 = arith.constant 1.000000e+00 : f32
    %106 = vector.broadcast %cst_30 : f32 to vector<2x64xf32>
    %107 = arith.addf %106, %105 : vector<2x64xf32>
    %108 = arith.divf %106, %107 : vector<2x64xf32>
    %109 = vector.extract_strided_slice %96 {offsets = [0, 128], sizes = [2, 64], strides = [1, 1]} : vector<2x256xf32> to vector<2x64xf32>
    %110 = math.tanh %109 : vector<2x64xf32>
    %111 = vector.extract_strided_slice %96 {offsets = [0, 192], sizes = [2, 64], strides = [1, 1]} : vector<2x256xf32> to vector<2x64xf32>
    %112 = arith.negf %111 : vector<2x64xf32>
    %113 = math.exp %112 : vector<2x64xf32>
    %cst_31 = arith.constant 1.000000e+00 : f32
    %114 = vector.broadcast %cst_31 : f32 to vector<2x64xf32>
    %115 = arith.addf %114, %113 : vector<2x64xf32>
    %116 = arith.divf %114, %115 : vector<2x64xf32>
    %117 = arith.mulf %108, %91 : vector<2x64xf32>
    %118 = arith.mulf %102, %110 : vector<2x64xf32>
    %119 = arith.addf %117, %118 : vector<2x64xf32>
    %120 = math.tanh %119 : vector<2x64xf32>
    %121 = arith.mulf %116, %120 : vector<2x64xf32>
    %122 = arith.index_cast %c2_i32 : i32 to index
    %c0_32 = arith.constant 0 : index
    %c0_33 = arith.constant 0 : index
    %123 = vector.load %arg2[%122, %c0_32, %c0_33] : memref<4x2x64xf32, #tpu.memory_space<vmem>>, vector<1x2x64xf32>
    %124 = vector.shape_cast %123 : vector<1x2x64xf32> to vector<2x64xf32>
    %125 = arith.mulf %124, %121 : vector<2x64xf32>
    %cst_34 = arith.constant 1.000000e+00 : f32
    %126 = vector.broadcast %cst_34 : f32 to vector<2x64xf32>
    %127 = arith.subf %126, %124 : vector<2x64xf32>
    %128 = arith.mulf %127, %86 : vector<2x64xf32>
    %129 = arith.addf %125, %128 : vector<2x64xf32>
    %130 = arith.mulf %124, %119 : vector<2x64xf32>
    %cst_35 = arith.constant 1.000000e+00 : f32
    %131 = vector.broadcast %cst_35 : f32 to vector<2x64xf32>
    %132 = arith.subf %131, %124 : vector<2x64xf32>
    %133 = arith.mulf %132, %91 : vector<2x64xf32>
    %134 = arith.addf %130, %133 : vector<2x64xf32>
    %c3_i32 = arith.constant 3 : i32
    %135 = arith.index_cast %c3_i32 : i32 to index
    %c0_36 = arith.constant 0 : index
    %c0_37 = arith.constant 0 : index
    %136 = vector.load %arg1[%135, %c0_36, %c0_37] : memref<4x2x256xf32, #tpu.memory_space<vmem>>, vector<1x2x256xf32>
    %137 = vector.shape_cast %136 : vector<1x2x256xf32> to vector<2x256xf32>
    %cst_38 = arith.constant dense<0.000000e+00> : vector<2x256xf32>
    %138 = tpu.matmul %129, %3, %cst_38 {dimension_numbers = #tpu.dot_dimension_numbers<[1], [0], [0], [1], [0, 0, 1, 1], [], []>} : vector<2x64xf32>, vector<64x256xf32>, vector<2x256xf32> -> vector<2x256xf32>
    %139 = arith.addf %137, %138 : vector<2x256xf32>
    %140 = vector.extract_strided_slice %139 {offsets = [0, 0], sizes = [2, 64], strides = [1, 1]} : vector<2x256xf32> to vector<2x64xf32>
    %141 = arith.negf %140 : vector<2x64xf32>
    %142 = math.exp %141 : vector<2x64xf32>
    %cst_39 = arith.constant 1.000000e+00 : f32
    %143 = vector.broadcast %cst_39 : f32 to vector<2x64xf32>
    %144 = arith.addf %143, %142 : vector<2x64xf32>
    %145 = arith.divf %143, %144 : vector<2x64xf32>
    %146 = vector.extract_strided_slice %139 {offsets = [0, 64], sizes = [2, 64], strides = [1, 1]} : vector<2x256xf32> to vector<2x64xf32>
    %147 = arith.negf %146 : vector<2x64xf32>
    %148 = math.exp %147 : vector<2x64xf32>
    %cst_40 = arith.constant 1.000000e+00 : f32
    %149 = vector.broadcast %cst_40 : f32 to vector<2x64xf32>
    %150 = arith.addf %149, %148 : vector<2x64xf32>
    %151 = arith.divf %149, %150 : vector<2x64xf32>
    %152 = vector.extract_strided_slice %139 {offsets = [0, 128], sizes = [2, 64], strides = [1, 1]} : vector<2x256xf32> to vector<2x64xf32>
    %153 = math.tanh %152 : vector<2x64xf32>
    %154 = vector.extract_strided_slice %139 {offsets = [0, 192], sizes = [2, 64], strides = [1, 1]} : vector<2x256xf32> to vector<2x64xf32>
    %155 = arith.negf %154 : vector<2x64xf32>
    %156 = math.exp %155 : vector<2x64xf32>
    %cst_41 = arith.constant 1.000000e+00 : f32
    %157 = vector.broadcast %cst_41 : f32 to vector<2x64xf32>
    %158 = arith.addf %157, %156 : vector<2x64xf32>
    %159 = arith.divf %157, %158 : vector<2x64xf32>
    %160 = arith.mulf %151, %134 : vector<2x64xf32>
    %161 = arith.mulf %145, %153 : vector<2x64xf32>
    %162 = arith.addf %160, %161 : vector<2x64xf32>
    %163 = math.tanh %162 : vector<2x64xf32>
    %164 = arith.mulf %159, %163 : vector<2x64xf32>
    %165 = arith.index_cast %c3_i32 : i32 to index
    %c0_42 = arith.constant 0 : index
    %c0_43 = arith.constant 0 : index
    %166 = vector.load %arg2[%165, %c0_42, %c0_43] : memref<4x2x64xf32, #tpu.memory_space<vmem>>, vector<1x2x64xf32>
    %167 = vector.shape_cast %166 : vector<1x2x64xf32> to vector<2x64xf32>
    %168 = arith.mulf %167, %164 : vector<2x64xf32>
    %cst_44 = arith.constant 1.000000e+00 : f32
    %169 = vector.broadcast %cst_44 : f32 to vector<2x64xf32>
    %170 = arith.subf %169, %167 : vector<2x64xf32>
    %171 = arith.mulf %170, %129 : vector<2x64xf32>
    %172 = arith.addf %168, %171 : vector<2x64xf32>
    %173 = arith.mulf %167, %162 : vector<2x64xf32>
    %cst_45 = arith.constant 1.000000e+00 : f32
    %174 = vector.broadcast %cst_45 : f32 to vector<2x64xf32>
    %175 = arith.subf %174, %167 : vector<2x64xf32>
    %176 = arith.mulf %175, %134 : vector<2x64xf32>
    %177 = arith.addf %173, %176 : vector<2x64xf32>
    %c4_i32 = arith.constant 4 : i32
    %c0_46 = arith.constant 0 : index
    %c0_47 = arith.constant 0 : index
    %178 = vector.load %arg7[%c0_46, %c0_47] : memref<2x64xf32, #tpu.memory_space<vmem>>, vector<2x64xf32>
    tpu.vector_store %arg7[%c0_46, %c0_47], %172 {strides = array<i32>} : memref<2x64xf32, #tpu.memory_space<vmem>>, vector<2x64xf32>,
    %c0_48 = arith.constant 0 : index
    %c0_49 = arith.constant 0 : index
    %179 = vector.load %arg8[%c0_48, %c0_49] : memref<2x64xf32, #tpu.memory_space<vmem>>, vector<2x64xf32>
    tpu.vector_store %arg8[%c0_48, %c0_49], %177 {strides = array<i32>} : memref<2x64xf32, #tpu.memory_space<vmem>>, vector<2x64xf32>,
    %c1_i32_50 = arith.constant 1 : i32
    %180 = arith.cmpi eq, %arg0, %c1_i32_50 : i32
    %181 = arith.extui %180 : i1 to i32
    %c0_i32_51 = arith.constant 0 : i32
    %182 = arith.cmpi ne, %181, %c0_i32_51 : i32
    scf.if %182 {
      %c0_52 = arith.constant 0 : index
      %c0_53 = arith.constant 0 : index
      %183 = vector.load %arg4[%c0_52, %c0_53] : memref<64x1xf32, #tpu.memory_space<vmem>>, vector<64x1xf32>
      %cst_54 = arith.constant dense<0.000000e+00> : vector<2x1xf32>
      %184 = tpu.matmul %172, %183, %cst_54 {dimension_numbers = #tpu.dot_dimension_numbers<[1], [0], [0], [1], [0, 0, 1, 1], [], []>} : vector<2x64xf32>, vector<64x1xf32>, vector<2x1xf32> -> vector<2x1xf32>
      %c0_55 = arith.constant 0 : index
      %c0_56 = arith.constant 0 : index
      %185 = vector.load %arg5[%c0_55, %c0_56] : memref<1x1xf32, #tpu.memory_space<vmem>>, vector<1x1xf32>
      %186 = vector.broadcast %185 : vector<1x1xf32> to vector<2x1xf32>
      %187 = arith.addf %184, %186 : vector<2x1xf32>
      %188 = arith.negf %187 : vector<2x1xf32>
      %189 = math.exp %188 : vector<2x1xf32>
      %cst_57 = arith.constant 1.000000e+00 : f32
      %190 = vector.broadcast %cst_57 : f32 to vector<2x1xf32>
      %191 = arith.addf %190, %189 : vector<2x1xf32>
      %192 = arith.divf %190, %191 : vector<2x1xf32>
      %c0_58 = arith.constant 0 : index
      %c0_59 = arith.constant 0 : index
      %193 = vector.load %arg6[%c0_58, %c0_59] : memref<2x1xf32, #tpu.memory_space<vmem>>, vector<2x1xf32>
      tpu.vector_store %arg6[%c0_58, %c0_59], %192 {strides = array<i32>} : memref<2x1xf32, #tpu.memory_space<vmem>>, vector<2x1xf32>,
    } else {
    }
    return
  }
  func.func @transform_0(%arg0: i32) -> (i32, i32, i32) {
    %c0_i32 = arith.constant 0 : i32
    %c0_i32_0 = arith.constant 0 : i32
    %c0_i32_1 = arith.constant 0 : i32
    return %arg0, %c0_i32, %c0_i32_0 : i32, i32, i32
  }
  func.func @transform_1(%arg0: i32) -> (i32, i32, i32) {
    %c0_i32 = arith.constant 0 : i32
    %c0_i32_0 = arith.constant 0 : i32
    %c0_i32_1 = arith.constant 0 : i32
    return %arg0, %c0_i32, %c0_i32_0 : i32, i32, i32
  }
  func.func @transform_2(%arg0: i32) -> (i32, i32) {
    %c0_i32 = arith.constant 0 : i32
    %c0_i32_0 = arith.constant 0 : i32
    %c0_i32_1 = arith.constant 0 : i32
    return %c0_i32, %c0_i32_0 : i32, i32
  }
  func.func @transform_3(%arg0: i32) -> (i32, i32) {
    %c0_i32 = arith.constant 0 : i32
    %c0_i32_0 = arith.constant 0 : i32
    %c0_i32_1 = arith.constant 0 : i32
    return %c0_i32, %c0_i32_0 : i32, i32
  }
  func.func @transform_4(%arg0: i32) -> (i32, i32) {
    %c0_i32 = arith.constant 0 : i32
    %c0_i32_0 = arith.constant 0 : i32
    %c0_i32_1 = arith.constant 0 : i32
    return %c0_i32, %c0_i32_0 : i32, i32
  }
  func.func @transform_5(%arg0: i32) -> (i32, i32) {
    %c0_i32 = arith.constant 0 : i32
    %c0_i32_0 = arith.constant 0 : i32
    %c0_i32_1 = arith.constant 0 : i32
    return %c0_i32, %c0_i32_0 : i32, i32
  }
}

</mosaic_0001>

<bundles_post_ra>
// kernel: tpu_custom_call.1
= control target key start
LH: loop header
LB: loop body
LE: loop exit
PB: predicated region body
PF: predicated region fallthrough
CT: control target
= control target key end

     0   :  { %s1532_s0 = inlined_call_operand.vmem [shape: f32[8,2,256], index: 0, kind: input, shape index: {}]   ;;  %s1533_s1 = inlined_call_operand.vmem [shape: f32[8,2,64], index: 1, kind: input, shape index: {}]   ;;  %s1534_s2 = inlined_call_operand.hbm [shape: f32[64,256], index: 2, kind: input, shape index: {}]   ;;  %s1535_s3 = inlined_call_operand.vmem [shape: f32[64,1], index: 3, kind: input, shape index: {}]   ;;  %s1536_s4 = inlined_call_operand.<no memory space> [shape: f32[1,1], index: 4, kind: input, shape index: {}]   ;;  %s1537_s5 = inlined_call_operand.vmem [shape: f32[2,1], index: 5, kind: output, shape index: {}]  }
   0x1   :  { %v10_v0 = vstv %s1536_s4 }
   0x2   :  { %11 = vst [vmem:[#allocation4] sm:$0x1] %v10_v0 }
   0x3   :  { %12 = vsyncpa [#allocation6], 0  ;;  %s1345_s20 = smov 0  }
   0x4 LB: > { %s1351_s21 = sadd.s32 4294967295, %s1300_s20   ;;  %p1042_p0 = scmp.ge.s32.totalorder %s1300_s20, 1  ;;  %s1300_s20 = sphi %s1345_s20, %s18_s20  }
   0x5   : > { %p159_p1 = scmp.lt.s32.totalorder %s1300_s20, 3  ;;  %s1302_s4 = smov [#allocation5]  }
   0x6   : > { %s171_s22 = sshll.u32 %s1302_s4, 4  ;;  %p1538_p4 = scmp.eq.s32.totalorder %s1351_s21, 0  ;;  %s172_s22 = int_to_ptr.vmem [resolvable:$true] %s171_s22 }
   0x7   : > { %p1356_p3 = pnand %p1042_p0, %p159_p1  ;;  %s1262_s27 = scalar_lea.hbm %s1534_s2, 2048 }
   0x8   : > { %p1263_p7 = scmp.ne.s32.totalorder %s1534_s2, %s1262_s27  ;;  %p1269_p11 = scmp.lt.u32.totalorder %s1262_s27, %s1534_s2 }
   0x9   : > { %s1540_s23 = scalar_select %p1356_p3, 1, 0 }
   0xa   : > { %p1186_p5 = pneg %p1356_p3 }
   0xc   : > { %p1365_p6 = pnand %p1538_p4, %p1186_p5 }
   0xe   : > { %p1264_p8 = pneg %p1365_p6 }
  0x10   : > { %p1265_p9 = pnand %p1264_p8, %p1263_p7 }
  0x12   : > { %p1266_p10 = pneg %p1265_p9 }
  0x14   : > { %p1271_p12 = pnand %p1269_p11, %p1266_p10 }
  0x16   : > { %1274 = shalt.err (!%p1271_p12)
}
  0x17   : > { %s1275_s7 = scalar_lea.vmem %s172_s22, 2048  ;;  %p1283_p5 = scmp.lt.s32.totalorder %s172_s22, %s172_s22 }
  0x18   : > { %p1276_p13 = scmp.ne.s32.totalorder %s172_s22, %s1275_s7  ;;  %p1284_p2 = scmp.lt.s32.totalorder %s1275_s7, %s1275_s7 }
  0x1a   : > { %p1278_p0 = pnand %p1276_p13, %p1264_p8  ;;  %p1285_p4 = por %p1284_p2, %p1283_p5 }
  0x1c   : > { %p1279_p1 = pneg %p1278_p0 }
  0x1e   : > { %p1286_p3 = pnand %p1285_p4, %p1279_p1 }
  0x20   : > { %1289 = shalt.err (!%p1286_p3)
}
  0x21   : > { %s1303_s8 = smov 256   ;;  %s1304_s9 = smov 16  }
  0x22   : > { %1189 = dma.hbm_to_vmem [thread:$0]  (!%p1365_p6), %s1534_s2, 2048, %s172_s22, [#allocation6], %s1303_s8, %s1303_s8, %s1304_s9  }
  0x23   : > { %p1542_p7 = scmp.ne.s32.totalorder %s1540_s23, 0 }
  0x24   : > { %p1543_p9 = scmp.eq.s32.totalorder (!%p1542_p7), %s1351_s21, 0 }
  0x25   : > { %212 = sbr.rel (%p1542_p7) target bundleno = 2298 (0x8fa), region = 40 }
  0x2c   : > { %1295 = dma.done.wait (%p1543_p9), [#allocation6], 2048   ;;  %p1544_p8 = pmov %p1543_p9 }
  0x2d   : > { %s1047_s12 = sshll.u32 %s1351_s21, 2  ;;  %p1545_p3 = scmp.ne.s32.totalorder %s1351_s21, 0 }
  0x2e   : > { %1297 = vsyncadd (%p1544_p8), [#allocation6], 4294965248  ;;  %p242_p2 = scmp.lt.s32.totalorder %s1047_s12, 7  ;;  %vm258_vm0 = vcmask (!%p1545_p3), 517120   ;;  %v1305_v1 = vmov (!%p1545_p3), 0.0  }
  0x2f   : > { %257 = sbr.rel (%p1545_p3) target bundleno = 54 (0x36), region = 48  ;;  %259 = vst.msk [vmem:[#allocation2] sm:$0x3] (!%p1545_p3), %vm258_vm0, %v1305_v1  ;;  %260 = vst.msk [vmem:[#allocation3] sm:$0x3] (!%p1545_p3), %vm258_vm0, %v1305_v1 }
  0x30   : > { %s1547_s12 = smov (!%p242_p2, %s1047_s12), 7 }
  0x31   : > { %s1077_s13 = sshll.u32 %s1547_s12, 2  ;;  %s1051_s14 = sshll.u32 %s1547_s12, 1 }
  0x32   : > { %s1395_s17 = scalar_lea.vmem %s1532_s0, %s1077_s13  ;;  %s1400_s4 = scalar_lea.vmem %s1533_s1, %s1051_s14 }
  0x36 PF: > { %v262_v2 = vld [vmem:[#allocation5 + $0x8] sm:$0xff]  ;;  %v264_v3 = vld [vmem:[#allocation5 + $0x18] sm:$0xff]  ;;  %v261_v4 = vld [vmem:[#allocation5] sm:$0xff]  ;;  %v361_v5 = vlaneseq  ;;  %v1306_v10 = vmov 0.0   ;;  %v1307_v16 = vmov 1983009808  }
  0x37   : > { %v1106_v6 = vpack.c.bf16 %v264_v3, %v262_v2  ;;  %v263_v7 = vld [vmem:[#allocation5 + $0x10] sm:$0xff]  ;;  %v266_v8 = vld [vmem:[#allocation5 + $0x28] sm:$0xff]  ;;  %v268_v9 = vld [vmem:[#allocation5 + $0x38] sm:$0xff]  ;;  %348 = vmatprep.mubr.f32.mxu0 %v1306_v10  ;;  %499 = vmatprep.mubr.f32.mxu1 %v1306_v10  ;;  %v359_v17 = vunpack.c.l.s4 %v1307_v16  ;;  %s1308_s22 = smov 64   ;;  %vm280_vm1 = vcmask 523264   ;;  %vm886_vm2 = vcmask 517120  }
  0x38   : > { %v1406_v11 = vpack.c.bf16 %v263_v7, %v261_v4  ;;  %v1408_v12 = vpack.c.bf16 %v268_v9, %v266_v8  ;;  %v265_v13 = vld [vmem:[#allocation5 + $0x20] sm:$0xff]  ;;  %v267_v14 = vld [vmem:[#allocation5 + $0x30] sm:$0xff]  ;;  %v270_v15 = vld [vmem:[#allocation5 + $0x48] sm:$0xff]  ;;  %v362_v18 = vshrl.u32 %v361_v5, 7  ;;  %p1071_p4 = scmp.ne.s32.totalorder %s1351_s21, 1 }
  0x39   : > { %1107 = vmatprep.subr.bf16.mxu0 %v1106_v6  ;;  %v272_v19 = vld [vmem:[#allocation5 + $0x58] sm:$0xff]  ;;  %1123 = vmatprep.subr.bf16.mxu1 %v1106_v6  ;;  %v1411_v20 = vpack.c.bf16 %v267_v14, %v265_v13  ;;  %v360_v21 = vunpack.c.0.s8 %v359_v17  ;;  %v269_v23 = vld [vmem:[#allocation5 + $0x40] sm:$0xff]  ;;  %v271_v24 = vld [vmem:[#allocation5 + $0x50] sm:$0xff]  ;;  %vm1310_vm3 = vmmov (!%p1071_p4), 0   ;;  %vm987_vm4 = vcmask (!%p1071_p4), 1024  }
  0x3a   : > { %1109 = vmatpush1.bf16.msra.mxu0 %v1406_v11  ;;  %1125 = vmatpush1.bf16.msra.mxu1 %v1406_v11  ;;  %v1415_v22 = vpack.c.bf16 %v272_v19, %v270_v15  ;;  %v1417_v25 = vld [vmem:[#allocation3] sm:$0x3]  ;;  %v274_v26 = vld [vmem:[#allocation5 + $0x68] sm:$0xff]  ;;  %v1423_v29 = vpack.c.bf16 %v271_v24, %v269_v23  ;;  %v273_v32 = vld [vmem:[#allocation5 + $0x60] sm:$0xff] }
  0x3b   : > { %1111 = vmatprep.subr.bf16.mxu0 %v1408_v12  ;;  %1127 = vmatprep.subr.bf16.mxu1 %v1408_v12  ;;  %v276_v27 = vld [vmem:[#allocation5 + $0x78] sm:$0xff]  ;;  %v1420_v28 = vsub.s32 %v360_v21, %v362_v18  ;;  %v275_v33 = vld [vmem:[#allocation5 + $0x70] sm:$0xff] }
  0x3c   : > { %v1429_v31 = vpack.c.bf16 %v276_v27, %v274_v26  ;;  %v1434_v34 = vpack.c.bf16 %v275_v33, %v273_v32  ;;  %v277_v35 = vld [vmem:[#allocation2] sm:$0x3]  ;;  %v1056_v15 = vld [vmem:[%s1395_s17 + $0x4] sm:$0xf]  ;;  %v1060_v33 = vld [vmem:[%s1400_s4 + $0x2] sm:$0x3] }
  0x3d   : > { %v394_v30 = vrot.slane %v1417_v25, %v1420_v28  ;;  %v279_v39 = vld [vmem:[%s1395_s17] sm:$0xf] }
  0x3e   : > { %1113 = vmatpush1.bf16.msra.mxu0 %v1411_v20  ;;  %1129 = vmatpush1.bf16.msra.mxu1 %v1411_v20  ;;  %v411_v59 = vld [vmem:[%s1400_s4] sm:$0x3] }
  0x3f   : > { %1115 = vmatprep.subr.bf16.mxu0 %v1415_v22  ;;  %1131 = vmatprep.subr.bf16.mxu1 %v1415_v22  ;;  %v413_v61 = vsub.f32 1.0, %v411_v59 }
  0x40   : > { %395 = vrot.lane.b32.xlu0 %v394_v30, %s1308_s22 }
  0x41   : > { %v428_v62 = vmul.f32 %v413_v61, %v1417_v25  ;;  %v414_v5 = vmul.f32 %v413_v61, %v277_v35 }
  0x42   : > { %1117 = vmatpush1.bf16.msra.mxu0 %v1423_v29  ;;  %1133 = vmatpush1.bf16.msra.mxu1 %v1423_v29 }
  0x43   : > { %1119 = vmatprep.subr.bf16.mxu0 %v1429_v31  ;;  %1135 = vmatprep.subr.bf16.mxu1 %v1429_v31 }
  0x46   : > { %1121 = vmatpush1.bf16.msra.mxu0 %v1434_v34  ;;  %1137 = vmatpush1.bf16.msra.mxu1 %v1434_v34 }
  0x47   : > { %1139 = vmatprep.subr.bf16.mxu0 %v1106_v6  ;;  %1155 = vmatprep.subr.bf16.mxu1 %v1106_v6 }
  0x49   : > { %1053 = vmatmul.mubr.msk.f32.vlgmr.msra.gmra.mrb[0].mxu0 %vm280_vm1, %v277_v35  ;;  %v565_v35 = vsub.f32 1.0, %v1060_v33 }
  0x4a   : > { %1141 = vmatpush1.bf16.msra.mxu0 %v1406_v11  ;;  %651 = vmatprep.mubr.f32.mxu0 %v1306_v10 }
  0x4b   : > { %1143 = vmatprep.subr.bf16.mxu0 %v1408_v12 }
  0x4e   : > { %1145 = vmatpush1.bf16.msra.mxu0 %v1411_v20 }
  0x4f   : > { %1147 = vmatprep.subr.bf16.mxu0 %v1415_v22 }
  0x52   : > { %1149 = vmatpush1.bf16.msra.mxu0 %v1423_v29 }
  0x53   : > { %1151 = vmatprep.subr.bf16.mxu0 %v1429_v31 }
  0x56   : > { %1153 = vmatpush1.bf16.msra.mxu0 %v1434_v34 }
  0xb2   : > { %v396_v49 = vpop.permute.xlu0 %395 }
 0x11c   : > { %v350_v36 = vpop.f32.mrb[0].mxu0 }
 0x11d   : > { %v352_v37 = vpop.f32.mrb[1].mxu0 }
 0x11e   : > { %v357_v38 = vcombine.low %v350_v36, %v352_v37 }
 0x120   : > { %v364_v40 = vrot.slane %v357_v38, %v1420_v28 }
 0x122   : > { %v366_v41 = vadd.f32 %v364_v40, %v279_v39 }
 0x124   : > { %377 = vrot.lane.b32.xlu1 %v366_v41, %s1308_s22  ;;  %v1054_v42 = vmul.f32 -1.442695, %v366_v41  ;;  %v374_v43 = vrot.slane %v366_v41, 2 }
 0x126   : > { %1210 = vpow2.f32 %v1054_v42 }
 0x127   : > { %1212 = vtanh.f32 %v374_v43 }
 0x130   : > { %v1211_v44 = vpop.eup %1210 }
 0x131   : > { %v370_v45 = vadd.f32 1.0, %v1211_v44  ;;  %v1213_v46 = vpop.eup %1212 }
 0x133   : > { %1214 = vrcp.f32 %v370_v45 }
 0x13d   : > { %v1215_v47 = vpop.eup %1214 }
 0x13e   : > { %v399_v48 = vmul.f32 %v1215_v47, %v1213_v46  ;;  %v398_v50 = vmul.f32 %v1215_v47, %v396_v49 }
 0x140   : > { %401 = vrot.lane.b32.xlu0 %v399_v48, %s1308_s22 }
 0x196   : > { %v378_v55 = vpop.permute.xlu1 %377 }
 0x197   : > { %v379_v56 = vrot.slane %v378_v55, 2 }
 0x199   : > { %v1055_v57 = vmul.f32 -1.442695, %v379_v56 }
 0x1b2   : > { %v402_v51 = vpop.permute.xlu0 %401 }
 0x1b3   : > { %v404_v52 = vadd.f32 %v402_v51, %v398_v50  ;;  %v1061_v50 = vld [vmem:[%s1395_s17 + $0x8] sm:$0xf] }
 0x1b5   : > { %1216 = vtanh.f32 %v404_v52  ;;  %v423_v53 = vrot.slane %v404_v52, %v1420_v28 }
 0x1b6   : > { %1218 = vpow2.f32 %v1055_v57 }
 0x1b7   : > { %424 = vrot.lane.b32.xlu0 %v423_v53, %s1308_s22 }
 0x1bf   : > { %v1217_v54 = vpop.eup %1216 }
 0x1c0   : > { %407 = vrot.lane.b32.xlu1 %v1217_v54, %s1308_s22  ;;  %v1219_v58 = vpop.eup %1218 }
 0x1c1   : > { %v384_v60 = vadd.f32 1.0, %v1219_v58 }
 0x1c3   : > { %1220 = vrcp.f32 %v384_v60 }
 0x1cd   : > { %v1221_v3 = vpop.eup %1220 }
 0x229   : > { %v425_v63 = vpop.permute.xlu0 %424 }
 0x22a   : > { %v427_v0 = vmul.f32 %v425_v63, %v411_v59 }
 0x22c   : > { %v429_v1 = vadd.f32 %v428_v62, %v427_v0 }
 0x22e   : > { %v545_v2 = vrot.slane %v429_v1, %v1420_v28  ;;  %v580_v37 = vmul.f32 %v565_v35, %v429_v1 }
 0x230   : > { %546 = vrot.lane.b32.xlu1 %v545_v2, %s1308_s22 }
 0x232   : > { %v408_v4 = vpop.permute.xlu1 %407 }
 0x233   : > { %v410_v6 = vmul.f32 %v1221_v3, %v408_v4 }
 0x235   : > { %v412_v7 = vmul.f32 %v411_v59, %v410_v6  ;;  %v1065_v6 = vld [vmem:[%s1400_s4 + $0x4] sm:$0x3] }
 0x237   : > { %v415_v8 = vadd.f32 %v414_v5, %v412_v7 }
 0x239   : > { %1057 = vmatmul.mubr.msk.f32.vlgmr.msra.gmra.mrb[0].mxu1 %vm280_vm1, %v415_v8  ;;  %v566_v44 = vmul.f32 %v565_v35, %v415_v8  ;;  %v717_v8 = vsub.f32 1.0, %v1065_v6 }
 0x23a   : > { %1157 = vmatpush1.bf16.msra.mxu1 %v1406_v11  ;;  %803 = vmatprep.mubr.f32.mxu1 %v1306_v10 }
 0x23b   : > { %1159 = vmatprep.subr.bf16.mxu1 %v1408_v12 }
 0x23e   : > { %1161 = vmatpush1.bf16.msra.mxu1 %v1411_v20 }
 0x23f   : > { %1163 = vmatprep.subr.bf16.mxu1 %v1415_v22 }
 0x242   : > { %1165 = vmatpush1.bf16.msra.mxu1 %v1423_v29 }
 0x243   : > { %1167 = vmatprep.subr.bf16.mxu1 %v1429_v31 }
 0x246   : > { %1169 = vmatpush1.bf16.msra.mxu1 %v1434_v34 }
 0x2a2   : > { %v547_v22 = vpop.permute.xlu1 %546 }
 0x30c   : > { %v501_v9 = vpop.f32.mrb[0].mxu1 }
 0x30d   : > { %v503_v13 = vpop.f32.mrb[1].mxu1 }
 0x30e   : > { %v508_v14 = vcombine.low %v501_v9, %v503_v13 }
 0x310   : > { %v515_v11 = vrot.slane %v508_v14, %v1420_v28 }
 0x312   : > { %v517_v16 = vadd.f32 %v1056_v15, %v515_v11 }
 0x314   : > { %528 = vrot.lane.b32.xlu1 %v517_v16, %s1308_s22  ;;  %v1058_v10 = vmul.f32 -1.442695, %v517_v16  ;;  %v525_v12 = vrot.slane %v517_v16, 2 }
 0x316   : > { %1222 = vpow2.f32 %v1058_v10 }
 0x317   : > { %1224 = vtanh.f32 %v525_v12 }
 0x320   : > { %v1223_v17 = vpop.eup %1222 }
 0x321   : > { %v521_v18 = vadd.f32 1.0, %v1223_v17  ;;  %v1225_v19 = vpop.eup %1224 }
 0x323   : > { %1226 = vrcp.f32 %v521_v18 }
 0x32d   : > { %v1227_v20 = vpop.eup %1226 }
 0x32e   : > { %v550_v21 = vmul.f32 %v1227_v20, %v1225_v19  ;;  %v549_v23 = vmul.f32 %v1227_v20, %v547_v22 }
 0x330   : > { %552 = vrot.lane.b32.xlu0 %v550_v21, %s1308_s22 }
 0x386   : > { %v529_v29 = vpop.permute.xlu1 %528 }
 0x387   : > { %v530_v30 = vrot.slane %v529_v29, 2 }
 0x389   : > { %v1059_v31 = vmul.f32 -1.442695, %v530_v30 }
 0x3a2   : > { %v553_v24 = vpop.permute.xlu0 %552 }
 0x3a3   : > { %v555_v25 = vadd.f32 %v553_v24, %v549_v23  ;;  %v1066_v23 = vld [vmem:[%s1395_s17 + $0xc] sm:$0xf] }
 0x3a5   : > { %1228 = vtanh.f32 %v555_v25  ;;  %v575_v26 = vrot.slane %v555_v25, %v1420_v28 }
 0x3a6   : > { %1230 = vpow2.f32 %v1059_v31 }
 0x3a7   : > { %576 = vrot.lane.b32.xlu1 %v575_v26, %s1308_s22 }
 0x3af   : > { %v1229_v27 = vpop.eup %1228 }
 0x3b0   : > { %558 = vrot.lane.b32.xlu0 %v1229_v27, %s1308_s22  ;;  %v1231_v32 = vpop.eup %1230 }
 0x3b1   : > { %v535_v34 = vadd.f32 1.0, %v1231_v32 }
 0x3b3   : > { %1232 = vrcp.f32 %v535_v34 }
 0x3bd   : > { %v1233_v41 = vpop.eup %1232 }
 0x419   : > { %v577_v36 = vpop.permute.xlu1 %576 }
 0x41a   : > { %v579_v38 = vmul.f32 %v1060_v33, %v577_v36 }
 0x41c   : > { %v581_v39 = vadd.f32 %v580_v37, %v579_v38 }
 0x41e   : > { %v697_v40 = vrot.slane %v581_v39, %v1420_v28  ;;  %v732_v13 = vmul.f32 %v717_v8, %v581_v39 }
 0x420   : > { %698 = vrot.lane.b32.xlu0 %v697_v40, %s1308_s22 }
 0x422   : > { %v559_v42 = vpop.permute.xlu0 %558 }
 0x423   : > { %v561_v43 = vmul.f32 %v1233_v41, %v559_v42 }
 0x425   : > { %v564_v45 = vmul.f32 %v1060_v33, %v561_v43 }
 0x427   : > { %v567_v46 = vadd.f32 %v566_v44, %v564_v45  ;;  %v1070_v44 = vld [vmem:[%s1400_s4 + $0x6] sm:$0x3] }
 0x429   : > { %1062 = vmatmul.mubr.msk.f32.vlgmr.msra.gmra.mrb[2].mxu0 %vm280_vm1, %v567_v46  ;;  %v718_v17 = vmul.f32 %v717_v8, %v567_v46  ;;  %v869_v46 = vsub.f32 1.0, %v1070_v44 }
 0x492   : > { %v699_v60 = vpop.permute.xlu0 %698 }
 0x4fc   : > { %v653_v47 = vpop.f32.mrb[2].mxu0 }
 0x4fd   : > { %v655_v48 = vpop.f32.mrb[3].mxu0 }
 0x4fe   : > { %v660_v49 = vcombine.low %v653_v47, %v655_v48 }
 0x500   : > { %v667_v51 = vrot.slane %v660_v49, %v1420_v28 }
 0x502   : > { %v669_v52 = vadd.f32 %v1061_v50, %v667_v51 }
 0x504   : > { %v1063_v53 = vmul.f32 -1.442695, %v669_v52  ;;  %680 = vrot.lane.b32.xlu0 %v669_v52, %s1308_s22  ;;  %v677_v54 = vrot.slane %v669_v52, 2 }
 0x506   : > { %1234 = vpow2.f32 %v1063_v53 }
 0x507   : > { %1236 = vtanh.f32 %v677_v54 }
 0x510   : > { %v1235_v55 = vpop.eup %1234 }
 0x511   : > { %v673_v56 = vadd.f32 1.0, %v1235_v55  ;;  %v1237_v57 = vpop.eup %1236 }
 0x513   : > { %1238 = vrcp.f32 %v673_v56  ;;  %v893_v56 = vld [vmem:[%s1535_s3] sm:$0xff] (!%p1071_p4) }
 0x51d   : > { %v1239_v58 = vpop.eup %1238 }
 0x51e   : > { %v702_v59 = vmul.f32 %v1239_v58, %v1237_v57  ;;  %v701_v61 = vmul.f32 %v1239_v58, %v699_v60  ;;  %v894_v57 = vld [vmem:[%s1535_s3 + $0x8] sm:$0xff] (!%p1071_p4)  ;;  %v895_v58 = vld [vmem:[%s1535_s3 + $0x10] sm:$0xff] (!%p1071_p4) }
 0x51f   : > { %v1171_v60 = vpack.c.bf16 (!%p1071_p4), %v894_v57, %v893_v56 }
 0x520   : > { %704 = vrot.lane.b32.xlu1 %v702_v59, %s1308_s22  ;;  %v1309_v59 = vmov (!%p1071_p4), 0.0|0.0  }
 0x521   : > { %1170 = vmatprep.subr.bf16.mxu0 (!%p1071_p4), %v1309_v59 }
 0x522   : > { %1172 = vmatpush3.bf16.msra.mxu0 (!%p1071_p4), %v1171_v60 }
 0x523   : > { %1173 = vmatprep.subr.bf16.mxu0 (!%p1071_p4), %v1309_v59 }
 0x576   : > { %v681_v2 = vpop.permute.xlu0 %680 }
 0x577   : > { %v682_v3 = vrot.slane %v681_v2, 2 }
 0x579   : > { %v1064_v4 = vmul.f32 -1.442695, %v682_v3  ;;  %v899_v3 = vld [vmem:[%s1535_s3 + $0x30] sm:$0xff] (!%p1071_p4) }
 0x592   : > { %v705_v62 = vpop.permute.xlu1 %704 }
 0x593   : > { %v707_v63 = vadd.f32 %v705_v62, %v701_v61  ;;  %v896_v61 = vld [vmem:[%s1535_s3 + $0x18] sm:$0xff] (!%p1071_p4)  ;;  %v1311_v62 = vmov (!%p1071_p4), 0.0  }
 0x594   : > { %1103 = vmatprep.mubr.msk.f32.mxu0 (!%p1071_p4), %vm1310_vm3, %v1311_v62 }
 0x595   : > { %1240 = vtanh.f32 %v707_v63  ;;  %v727_v0 = vrot.slane %v707_v63, %v1420_v28  ;;  %v1174_v63 = vpack.c.bf16 (!%p1071_p4), %v896_v61, %v895_v58 }
 0x596   : > { %1242 = vpow2.f32 %v1064_v4  ;;  %v900_v4 = vld [vmem:[%s1535_s3 + $0x38] sm:$0xff] (!%p1071_p4) }
 0x597   : > { %728 = vrot.lane.b32.xlu0 %v727_v0, %s1308_s22  ;;  %v897_v0 = vld [vmem:[%s1535_s3 + $0x20] sm:$0xff] (!%p1071_p4)  ;;  %1175 = vmatpush3.bf16.msra.mxu0 (!%p1071_p4), %v1174_v63 }
 0x598   : > { %1176 = vmatprep.subr.bf16.mxu0 (!%p1071_p4), %v1309_v59 }
 0x59f   : > { %v1241_v1 = vpop.eup %1240 }
 0x5a0   : > { %710 = vrot.lane.b32.xlu1 %v1241_v1, %s1308_s22  ;;  %v1243_v5 = vpop.eup %1242  ;;  %v898_v1 = vld [vmem:[%s1535_s3 + $0x28] sm:$0xff] (!%p1071_p4) }
 0x5a1   : > { %v687_v7 = vadd.f32 1.0, %v1243_v5  ;;  %v1177_v2 = vpack.c.bf16 (!%p1071_p4), %v898_v1, %v897_v0  ;;  %v1180_v5 = vpack.c.bf16 (!%p1071_p4), %v900_v4, %v899_v3 }
 0x5a3   : > { %1244 = vrcp.f32 %v687_v7  ;;  %1178 = vmatpush3.bf16.msra.mxu0 (!%p1071_p4), %v1177_v2 }
 0x5a4   : > { %1179 = vmatprep.subr.bf16.mxu0 (!%p1071_p4), %v1309_v59 }
 0x5a7   : > { %1181 = vmatpush3.bf16.msra.mxu0 (!%p1071_p4), %v1180_v5 }
 0x5ad   : > { %v1245_v16 = vpop.eup %1244 }
 0x609   : > { %v729_v9 = vpop.permute.xlu0 %728 }
 0x60a   : > { %v731_v14 = vmul.f32 %v1065_v6, %v729_v9 }
 0x60c   : > { %v733_v15 = vadd.f32 %v732_v13, %v731_v14 }
 0x60e   : > { %v849_v11 = vrot.slane %v733_v15, %v1420_v28  ;;  %v884_v48 = vmul.f32 %v869_v46, %v733_v15 }
 0x610   : > { %850 = vrot.lane.b32.xlu1 %v849_v11, %s1308_s22 }
 0x612   : > { %v711_v10 = vpop.permute.xlu1 %710 }
 0x613   : > { %v713_v12 = vmul.f32 %v1245_v16, %v711_v10 }
 0x615   : > { %v716_v18 = vmul.f32 %v1065_v6, %v713_v12  ;;  %v1072_v6 = vld [vmem:[#allocation4] ss:$0 sm:$0xff] (!%p1071_p4) }
 0x617   : > { %v719_v19 = vadd.f32 %v718_v17, %v716_v18 }
 0x619   : > { %1067 = vmatmul.mubr.msk.f32.vlgmr.msra.gmra.mrb[2].mxu1 %vm280_vm1, %v719_v19  ;;  %v870_v53 = vmul.f32 %v869_v46, %v719_v19 }
 0x682   : > { %v851_v34 = vpop.permute.xlu1 %850 }
 0x6ec   : > { %v805_v20 = vpop.f32.mrb[2].mxu1 }
 0x6ed   : > { %v807_v21 = vpop.f32.mrb[3].mxu1 }
 0x6ee   : > { %v812_v22 = vcombine.low %v805_v20, %v807_v21 }
 0x6f0   : > { %v819_v24 = vrot.slane %v812_v22, %v1420_v28 }
 0x6f2   : > { %v821_v25 = vadd.f32 %v1066_v23, %v819_v24 }
 0x6f4   : > { %832 = vrot.lane.b32.xlu1 %v821_v25, %s1308_s22  ;;  %v1068_v26 = vmul.f32 -1.442695, %v821_v25  ;;  %v829_v27 = vrot.slane %v821_v25, 2 }
 0x6f6   : > { %1246 = vpow2.f32 %v1068_v26 }
 0x6f7   : > { %1248 = vtanh.f32 %v829_v27 }
 0x700   : > { %v1247_v29 = vpop.eup %1246 }
 0x701   : > { %v825_v30 = vadd.f32 1.0, %v1247_v29  ;;  %v1249_v31 = vpop.eup %1248 }
 0x703   : > { %1250 = vrcp.f32 %v825_v30 }
 0x70d   : > { %v1251_v32 = vpop.eup %1250 }
 0x70e   : > { %v854_v33 = vmul.f32 %v1251_v32, %v1249_v31  ;;  %v853_v35 = vmul.f32 %v1251_v32, %v851_v34 }
 0x710   : > { %856 = vrot.lane.b32.xlu0 %v854_v33, %s1308_s22 }
 0x766   : > { %v833_v40 = vpop.permute.xlu1 %832 }
 0x767   : > { %v834_v41 = vrot.slane %v833_v40, 2 }
 0x769   : > { %v1069_v42 = vmul.f32 -1.442695, %v834_v41 }
 0x782   : > { %v857_v36 = vpop.permute.xlu0 %856 }
 0x783   : > { %v859_v37 = vadd.f32 %v857_v36, %v853_v35 }
 0x785   : > { %1252 = vtanh.f32 %v859_v37  ;;  %v879_v38 = vrot.slane %v859_v37, %v1420_v28 }
 0x786   : > { %1254 = vpow2.f32 %v1069_v42 }
 0x787   : > { %880 = vrot.lane.b32.xlu1 %v879_v38, %s1308_s22 }
 0x78f   : > { %v1253_v39 = vpop.eup %1252 }
 0x790   : > { %862 = vrot.lane.b32.xlu0 %v1253_v39, %s1308_s22  ;;  %v1255_v43 = vpop.eup %1254 }
 0x791   : > { %v839_v45 = vadd.f32 1.0, %v1255_v43 }
 0x793   : > { %1256 = vrcp.f32 %v839_v45 }
 0x79d   : > { %v1257_v28 = vpop.eup %1256 }
 0x7f9   : > { %v881_v47 = vpop.permute.xlu1 %880 }
 0x7fa   : > { %v883_v49 = vmul.f32 %v1070_v44, %v881_v47 }
 0x7fc   : > { %v885_v50 = vadd.f32 %v884_v48, %v883_v49 }
 0x7fe   : > { %888 = vst.msk [vmem:[#allocation3] sm:$0x3] %vm886_vm2, %v885_v50 }
 0x802   : > { %v863_v51 = vpop.permute.xlu0 %862 }
 0x803   : > { %v865_v52 = vmul.f32 %v1257_v28, %v863_v51  ;;  %892 = sbr.rel (%p1071_p4) target bundleno = 2298 (0x8fa), region = 52 }
 0x805   : > { %v868_v54 = vmul.f32 %v1070_v44, %v865_v52 }
 0x807   : > { %v871_v55 = vadd.f32 %v870_v53, %v868_v54 }
 0x809   : > { %887 = vst.msk [vmem:[#allocation2] sm:$0x3] %vm886_vm2, %v871_v55  ;;  %1104 = vmatmul.mubr.msk.f32.vlgmr.msra.gmra.mrb[0].mxu0 (!%p1071_p4), %vm280_vm1, %v871_v55 }
 0x8dc   : > { %v977_v7 = vpop.f32.mrb[0].mxu0 }
 0x8dd   : > { %v978_v8 = vadd.f32 %v1072_v6, %v977_v7  ;;  %v1105_v9 = vpop.f32.mrb[1].mxu0 }
 0x8df   : > { %v1074_v13 = vmul.f32 -1.442695, %v978_v8 }
 0x8e1   : > { %1258 = vpow2.f32 %v1074_v13 }
 0x8eb   : > { %v1259_v14 = vpop.eup %1258 }
 0x8ec   : > { %v984_v15 = vadd.f32 1.0, %v1259_v14 }
 0x8ee   : > { %1260 = vrcp.f32 %v984_v15 }
 0x8f8   : > { %v1261_v11 = vpop.eup %1260 }
 0x8f9   : > { %988 = vst.msk [vmem:[%s1537_s5] sm:$0x3] %vm987_vm4, %v1261_v11 }
 0x8fa PF: > { %s18_s20 = sadd.s32 1, %s1300_s20  }
 0x8fb   : > { %p15_p6 = scmp.ge.s32.totalorder %s18_s20, 4  }
 0x8fd   :  { %17 = sbr.rel (!%p15_p6) target bundleno = 4 (0x4), region = 88 }
 0x904   :  { %1000 = vsyncpa [#allocation6], 1 }
 0x905   :  { %1002 = vsyncpa [#allocation6 + $0x1], 1 }

</bundles_post_ra>
